<compile_context>
chip_gen: v7x
topology: tpu7x:2x2x1
jax: 0.10.0
libtpu: 0.0.40
codegen_flags: <defaults>
</compile_context>

<pallas_src>
import jax
import jax.numpy as jnp
from jax import lax
from jax.experimental import pallas as pl
from jax.experimental.pallas import tpu as pltpu


def _round_up(a, m):
    return ((a + m - 1) // m) * m


def _mlp_kernel(*refs):
    """refs = (x_ref, w0_ref, b0_ref, w1_ref, b1_ref, ..., out_ref).

    x_ref  : (TB, in_features)   activations in natural NC (batch-major) layout
    wi_ref : (out_i, in_i)       PyTorch Linear layout
    bi_ref : (1, out_i)
    out_ref: (TB, hidden)
    """
    x_ref = refs[0]
    out_ref = refs[-1]
    param_refs = refs[1:-1]
    assert len(param_refs) % 2 == 0
    n_layers = len(param_refs) // 2

    h = x_ref[...]  # f32 (TB, in)
    for l in range(n_layers):
        w = param_refs[2 * l][...]      # (out, in)
        b = param_refs[2 * l + 1][...]  # (1, out)
        # h (TB, in) x W (out, in), contract in/in -> (TB, out).  "NT" matmul on
        # the MXU; absorbs the PyTorch weight layout without any transpose.
        acc = lax.dot_general(
            h, w,
            dimension_numbers=(((1,), (1,)), ((), ())),
            preferred_element_type=jnp.float32,
        ) + b
        h = jnp.maximum(acc, 0.0)  # ReLU (default activation_function)
        # dropout: identity in eval mode
    out_ref[...] = h.astype(out_ref.dtype)


def _xla_forward(x, weights, biases):
    """Plain XLA path for tiny batches (launch overhead > kernel benefit)."""
    h = x.astype(jnp.float32)
    for w, b in zip(weights, biases):
        h = jnp.maximum(h @ w.T + b, 0.0)
    return h


def imelt_forward(x, weights, biases, *, batch_tile=4096, min_pallas_batch=1024):
    """Run the i-MELT core network (hidden layers only, like model.forward).

    x       : (N, input_size) float32
    weights : list of (out, in) float32 arrays (PyTorch Linear layout), len == num_layers
    biases  : list of (out,)    float32 arrays, len == num_layers
    returns : (N, hidden_size) float32
    """
    n, in_dim = x.shape
    hidden = weights[-1].shape[0]

    if n < min_pallas_batch:
        # ~17 KFLOP network at small N: fused XLA dot+bias+relu is strictly
        # faster than a pallas_call plus pad/slice wrappers.
        return _xla_forward(x, weights, biases)

    # Batch tile: multiple of 128 (lane width).  Cap it so large batches keep
    # at least ~4 grid steps (v7x has 2 TensorCores; "parallel" sharding of the
    # batch axis needs multiple steps to help).
    tb = min(batch_tile, max(128, _round_up(pl.cdiv(n, 4), 128)))
    n_pad = _round_up(n, tb)

    x_f32 = x.astype(jnp.float32)
    if n_pad != n:
        x_f32 = jnp.pad(x_f32, ((0, n_pad - n), (0, 0)))

    # Biases as (1, out) tiles, broadcast over the batch (sublane) axis in-kernel.
    biases2d = [b.reshape(1, -1).astype(jnp.float32) for b in biases]
    weights = [w.astype(jnp.float32) for w in weights]

    operands = [x_f32]
    in_specs = [pl.BlockSpec((tb, in_dim), lambda i: (i, 0))]
    for w, b in zip(weights, biases2d):
        operands.append(w)
        operands.append(b)
        # Constant index_map -> parameters stay resident in VMEM across grid steps.
        in_specs.append(pl.BlockSpec(w.shape, lambda i: (0, 0)))
        in_specs.append(pl.BlockSpec(b.shape, lambda i: (0, 0)))
    out_spec = pl.BlockSpec((tb, hidden), lambda i: (i, 0))

    fn = pl.pallas_call(
        _mlp_kernel,
        out_shape=jax.ShapeDtypeStruct((n_pad, hidden), jnp.float32),
        grid=(n_pad // tb,),
        in_specs=in_specs,
        out_specs=out_spec,
        compiler_params=pltpu.CompilerParams(
            # Independent batch tiles -> shard across TensorCores on v7x.
            dimension_semantics=("parallel",),
            # Footprint is ~(tb*(in+hidden)*4 B)*2 buffers + ~10 KiB params,
            # < 3 MiB at tb=8192; 16 MiB limit is safe on every generation.
            vmem_limit_bytes=16 * 1024 * 1024,
        ),
    )
    out = fn(*operands)                       # (N_pad, hidden), no transpose needed
    return out if n_pad == n else out[:n]


def init_params(key, input_size, hidden_size, num_layers):
    """Deterministic PyTorch-Linear-style init: U(-1/sqrt(fan_in), 1/sqrt(fan_in)).

    Weights are returned in PyTorch layout (out_features, in_features).
    """
    weights, biases = [], []
    in_dim = input_size
    for _ in range(num_layers):
        key, kw, kb = jax.random.split(key, 3)
        bound = 1.0 / jnp.sqrt(jnp.float32(in_dim))
        w = jax.random.uniform(kw, (hidden_size, in_dim), jnp.float32, -bound, bound)
        b = jax.random.uniform(kb, (hidden_size,), jnp.float32, -bound, bound)
        weights.append(w)
        biases.append(b)
        in_dim = hidden_size
    return weights, biases


def reference_forward(x, weights, biases):
    h = x
    for w, b in zip(weights, biases):
        h = jnp.maximum(h @ w.T + b, 0.0)
    return h


if __name__ == "__main__":
    # Small shapes consistent with the module: 4 chemistry inputs
    # (sio2, al2o3, na2o, k2o), 32 hidden units, 3 hidden layers.
    input_size, hidden_size, num_layers = 4, 32, 3

    key = jax.random.PRNGKey(0)
    key, kx_small, kx_big = jax.random.split(key, 3)
    weights, biases = init_params(key, input_size, hidden_size, num_layers)

    # 1) Tiny batch, forced through the Pallas path (min_pallas_batch=0):
    #    single grid step, tb=128 with padding.
    x_small = jax.random.uniform(kx_small, (8, input_size), jnp.float32)
    out_small = jax.block_until_ready(
        imelt_forward(x_small, weights, biases, min_pallas_batch=0))
    ref_small = reference_forward(x_small, weights, biases)
    assert out_small.shape == (8, hidden_size)
    assert jnp.allclose(out_small, ref_small, atol=1e-5, rtol=1e-5)

    # 2) Larger batch exercising the batch grid (4 parallel grid steps).
    x_big = jax.random.uniform(kx_big, (2048, input_size), jnp.float32)
    out_big = jax.block_until_ready(imelt_forward(x_big, weights, biases))
    ref_big = reference_forward(x_big, weights, biases)
    assert out_big.shape == (2048, hidden_size)
    assert jnp.allclose(out_big, ref_big, atol=1e-5, rtol=1e-5)

    print("KERNEL_OK")
</pallas_src>

<mosaic_0001>
module attributes {stable_mosaic.version = 11 : i64} {
  func.func @_mlp_kernel(%arg0: i32, %arg1: memref<128x4xf32, #tpu.memory_space<vmem>>, %arg2: memref<32x4xf32, #tpu.memory_space<vmem>>, %arg3: memref<1x32xf32, #tpu.memory_space<vmem>>, %arg4: memref<32x32xf32, #tpu.memory_space<vmem>>, %arg5: memref<1x32xf32, #tpu.memory_space<vmem>>, %arg6: memref<32x32xf32, #tpu.memory_space<vmem>>, %arg7: memref<1x32xf32, #tpu.memory_space<vmem>>, %arg8: memref<128x32xf32, #tpu.memory_space<vmem>>) attributes {dimension_semantics = [#tpu.dimension_semantics<parallel>], iteration_bounds = array<i64: 1>, scalar_prefetch = 0 : i64, scratch_operands = 0 : i64, tpu.core_type = #tpu.core_type<tc>, window_params = [{transform_indices = @transform_0, window_bounds = array<i64: 128, 4>}, {pipeline_mode = #tpu.pipeline_mode<synchronous>, transform_indices = @transform_1, window_bounds = array<i64: 32, 4>}, {pipeline_mode = #tpu.pipeline_mode<synchronous>, transform_indices = @transform_2, window_bounds = array<i64: 1, 32>}, {pipeline_mode = #tpu.pipeline_mode<synchronous>, transform_indices = @transform_3, window_bounds = array<i64: 32, 32>}, {pipeline_mode = #tpu.pipeline_mode<synchronous>, transform_indices = @transform_4, window_bounds = array<i64: 1, 32>}, {pipeline_mode = #tpu.pipeline_mode<synchronous>, transform_indices = @transform_5, window_bounds = array<i64: 32, 32>}, {pipeline_mode = #tpu.pipeline_mode<synchronous>, transform_indices = @transform_6, window_bounds = array<i64: 1, 32>}, {transform_indices = @transform_7, window_bounds = array<i64: 128, 32>}]} {
    %c0 = arith.constant 0 : index
    %c0_0 = arith.constant 0 : index
    %0 = vector.load %arg1[%c0, %c0_0] : memref<128x4xf32, #tpu.memory_space<vmem>>, vector<128x4xf32>
    %c0_1 = arith.constant 0 : index
    %c0_2 = arith.constant 0 : index
    %1 = vector.load %arg2[%c0_1, %c0_2] : memref<32x4xf32, #tpu.memory_space<vmem>>, vector<32x4xf32>
    %c0_3 = arith.constant 0 : index
    %c0_4 = arith.constant 0 : index
    %2 = vector.load %arg3[%c0_3, %c0_4] : memref<1x32xf32, #tpu.memory_space<vmem>>, vector<1x32xf32>
    %cst = arith.constant dense<0.000000e+00> : vector<128x32xf32>
    %3 = tpu.matmul %0, %1, %cst {dimension_numbers = #tpu.dot_dimension_numbers<[1], [1], [0], [0], [0, 0, 1, 0], [], []>} : vector<128x4xf32>, vector<32x4xf32>, vector<128x32xf32> -> vector<128x32xf32>
    %4 = vector.broadcast %2 : vector<1x32xf32> to vector<128x32xf32>
    %5 = arith.addf %3, %4 : vector<128x32xf32>
    %cst_5 = arith.constant 0.000000e+00 : f32
    %6 = vector.broadcast %cst_5 : f32 to vector<128x32xf32>
    %7 = arith.maximumf %5, %6 : vector<128x32xf32>
    %c0_6 = arith.constant 0 : index
    %c0_7 = arith.constant 0 : index
    %8 = vector.load %arg4[%c0_6, %c0_7] : memref<32x32xf32, #tpu.memory_space<vmem>>, vector<32x32xf32>
    %c0_8 = arith.constant 0 : index
    %c0_9 = arith.constant 0 : index
    %9 = vector.load %arg5[%c0_8, %c0_9] : memref<1x32xf32, #tpu.memory_space<vmem>>, vector<1x32xf32>
    %cst_10 = arith.constant dense<0.000000e+00> : vector<128x32xf32>
    %10 = tpu.matmul %7, %8, %cst_10 {dimension_numbers = #tpu.dot_dimension_numbers<[1], [1], [0], [0], [0, 0, 1, 0], [], []>} : vector<128x32xf32>, vector<32x32xf32>, vector<128x32xf32> -> vector<128x32xf32>
    %11 = vector.broadcast %9 : vector<1x32xf32> to vector<128x32xf32>
    %12 = arith.addf %10, %11 : vector<128x32xf32>
    %cst_11 = arith.constant 0.000000e+00 : f32
    %13 = vector.broadcast %cst_11 : f32 to vector<128x32xf32>
    %14 = arith.maximumf %12, %13 : vector<128x32xf32>
    %c0_12 = arith.constant 0 : index
    %c0_13 = arith.constant 0 : index
    %15 = vector.load %arg6[%c0_12, %c0_13] : memref<32x32xf32, #tpu.memory_space<vmem>>, vector<32x32xf32>
    %c0_14 = arith.constant 0 : index
    %c0_15 = arith.constant 0 : index
    %16 = vector.load %arg7[%c0_14, %c0_15] : memref<1x32xf32, #tpu.memory_space<vmem>>, vector<1x32xf32>
    %cst_16 = arith.constant dense<0.000000e+00> : vector<128x32xf32>
    %17 = tpu.matmul %14, %15, %cst_16 {dimension_numbers = #tpu.dot_dimension_numbers<[1], [1], [0], [0], [0, 0, 1, 0], [], []>} : vector<128x32xf32>, vector<32x32xf32>, vector<128x32xf32> -> vector<128x32xf32>
    %18 = vector.broadcast %16 : vector<1x32xf32> to vector<128x32xf32>
    %19 = arith.addf %17, %18 : vector<128x32xf32>
    %cst_17 = arith.constant 0.000000e+00 : f32
    %20 = vector.broadcast %cst_17 : f32 to vector<128x32xf32>
    %21 = arith.maximumf %19, %20 : vector<128x32xf32>
    %c0_18 = arith.constant 0 : index
    %c0_19 = arith.constant 0 : index
    %22 = vector.load %arg8[%c0_18, %c0_19] : memref<128x32xf32, #tpu.memory_space<vmem>>, vector<128x32xf32>
    tpu.vector_store %arg8[%c0_18, %c0_19], %21 {strides = array<i32>} : memref<128x32xf32, #tpu.memory_space<vmem>>, vector<128x32xf32>,
    return
  }
  func.func @transform_0(%arg0: i32) -> (i32, i32) {
    %c0_i32 = arith.constant 0 : i32
    %c0_i32_0 = arith.constant 0 : i32
    return %arg0, %c0_i32 : i32, i32
  }
  func.func @transform_1(%arg0: i32) -> (i32, i32) {
    %c0_i32 = arith.constant 0 : i32
    %c0_i32_0 = arith.constant 0 : i32
    %c0_i32_1 = arith.constant 0 : i32
    return %c0_i32, %c0_i32_0 : i32, i32
  }
  func.func @transform_2(%arg0: i32) -> (i32, i32) {
    %c0_i32 = arith.constant 0 : i32
    %c0_i32_0 = arith.constant 0 : i32
    %c0_i32_1 = arith.constant 0 : i32
    return %c0_i32, %c0_i32_0 : i32, i32
  }
  func.func @transform_3(%arg0: i32) -> (i32, i32) {
    %c0_i32 = arith.constant 0 : i32
    %c0_i32_0 = arith.constant 0 : i32
    %c0_i32_1 = arith.constant 0 : i32
    return %c0_i32, %c0_i32_0 : i32, i32
  }
  func.func @transform_4(%arg0: i32) -> (i32, i32) {
    %c0_i32 = arith.constant 0 : i32
    %c0_i32_0 = arith.constant 0 : i32
    %c0_i32_1 = arith.constant 0 : i32
    return %c0_i32, %c0_i32_0 : i32, i32
  }
  func.func @transform_5(%arg0: i32) -> (i32, i32) {
    %c0_i32 = arith.constant 0 : i32
    %c0_i32_0 = arith.constant 0 : i32
    %c0_i32_1 = arith.constant 0 : i32
    return %c0_i32, %c0_i32_0 : i32, i32
  }
  func.func @transform_6(%arg0: i32) -> (i32, i32) {
    %c0_i32 = arith.constant 0 : i32
    %c0_i32_0 = arith.constant 0 : i32
    %c0_i32_1 = arith.constant 0 : i32
    return %c0_i32, %c0_i32_0 : i32, i32
  }
  func.func @transform_7(%arg0: i32) -> (i32, i32) {
    %c0_i32 = arith.constant 0 : i32
    %c0_i32_0 = arith.constant 0 : i32
    return %arg0, %c0_i32 : i32, i32
  }
}

</mosaic_0001>

<bundles_post_ra>
// kernel: tpu_custom_call.1
= control target key start
LH: loop header
LB: loop body
LE: loop exit
PB: predicated region body
PF: predicated region fallthrough
CT: control target
= control target key end

     0   :  { %vm53_vm0 = vcmask 31744   ;;  %vm286_vm2 = vcmask 261120   ;;  %s1308_s1 = inlined_call_operand.vmem [shape: f32[32,4], index: 1, kind: input, shape index: {}]   ;;  %s1309_s0 = inlined_call_operand.vmem [shape: f32[128,4], index: 0, kind: input, shape index: {}]   ;;  %s1310_s3 = inlined_call_operand.vmem [shape: f32[32,32], index: 3, kind: input, shape index: {}]   ;;  %s1311_s5 = inlined_call_operand.vmem [shape: f32[32,32], index: 5, kind: input, shape index: {}]   ;;  %s1312_s2 = inlined_call_operand.vmem [shape: f32[1,32], index: 2, kind: input, shape index: {}]   ;;  %s1313_s4 = inlined_call_operand.vmem [shape: f32[1,32], index: 4, kind: input, shape index: {}]   ;;  %s1314_s6 = inlined_call_operand.vmem [shape: f32[1,32], index: 6, kind: input, shape index: {}]   ;;  %s1315_s7 = inlined_call_operand.vmem [shape: f32[128,32], index: 7, kind: output, shape index: {}]  }
   0x1   :  { %v42_v0 = vld [vmem:[%s1308_s1] sm:$0xff]  ;;  %v43_v1 = vld [vmem:[%s1308_s1 + $0x8] sm:$0xff]  ;;  %vm1067_vm1 = vmpackc.low %vm53_vm0, %vm53_vm0 }
   0x2   :  { %v979_v3 = vpack.c.bf16 %v43_v1, %v42_v0  ;;  %v44_v4 = vld [vmem:[%s1308_s1 + $0x10] sm:$0xff]  ;;  %v45_v5 = vld [vmem:[%s1308_s1 + $0x18] sm:$0xff]  ;;  %v26_v6 = vld [vmem:[%s1309_s0] sm:$0xff] }
   0x3   :  { %v985_v7 = vpack.c.bf16 %v45_v5, %v44_v4  ;;  %891 = vmatprep.mubr.msk.f32.mxu0 %vm53_vm0, %v26_v6  ;;  %v34_v8 = vld [vmem:[%s1309_s0 + $0x40] sm:$0xff]  ;;  %v276_v10 = vld [vmem:[%s1310_s3 + $0x8] sm:$0xff]  ;;  %vm1105_vm3 = vmpackc.low %vm286_vm2, %vm286_vm2 }
   0x4   :  { %981 = vmatprep.subr.msk.bf16.mxu0 %vm1067_vm1, %v979_v3  ;;  %1015 = vmatprep.subr.msk.bf16.mxu1 %vm1067_vm1, %v979_v3  ;;  %v275_v9 = vld [vmem:[%s1310_s3] sm:$0xff]  ;;  %v277_v13 = vld [vmem:[%s1310_s3 + $0x10] sm:$0xff]  ;;  %v278_v14 = vld [vmem:[%s1310_s3 + $0x18] sm:$0xff] }
   0x5   :  { %984 = vmatpush3.bf16.xpose.msk.msra.mxu0 %vm1067_vm1, %v979_v3  ;;  %1017 = vmatpush3.bf16.xpose.msk.msra.mxu1 %vm1067_vm1, %v979_v3  ;;  %v991_v11 = vpack.c.bf16 %v276_v10, %v275_v9  ;;  %v27_v15 = vld [vmem:[%s1309_s0 + $0x8] sm:$0xff]  ;;  %v28_v17 = vld [vmem:[%s1309_s0 + $0x10] sm:$0xff]  ;;  %v997_v19 = vpack.c.bf16 %v278_v14, %v277_v13  ;;  %v29_v20 = vld [vmem:[%s1309_s0 + $0x18] sm:$0xff] }
   0x6   :  { %987 = vmatprep.subr.msk.bf16.mxu0 %vm1067_vm1, %v985_v7  ;;  %1016 = vmatprep.subr.msk.bf16.mxu1 %vm1067_vm1, %v985_v7  ;;  %v35_v16 = vld [vmem:[%s1309_s0 + $0x48] sm:$0xff]  ;;  %v36_v18 = vld [vmem:[%s1309_s0 + $0x50] sm:$0xff]  ;;  %v37_v21 = vld [vmem:[%s1309_s0 + $0x58] sm:$0xff] }
   0x7   :  { %903 = vmatprep.mubr.msk.f32.mxu1 %vm53_vm0, %v34_v8  ;;  %v30_v22 = vld [vmem:[%s1309_s0 + $0x20] sm:$0xff]  ;;  %v31_v24 = vld [vmem:[%s1309_s0 + $0x28] sm:$0xff]  ;;  %v32_v26 = vld [vmem:[%s1309_s0 + $0x30] sm:$0xff] }
   0x8   :  { %v38_v23 = vld [vmem:[%s1309_s0 + $0x60] sm:$0xff]  ;;  %v39_v25 = vld [vmem:[%s1309_s0 + $0x68] sm:$0xff]  ;;  %v40_v27 = vld [vmem:[%s1309_s0 + $0x70] sm:$0xff] }
   0x9   :  { %v33_v28 = vld [vmem:[%s1309_s0 + $0x38] sm:$0xff]  ;;  %v508_v30 = vld [vmem:[%s1311_s5] sm:$0xff]  ;;  %v509_v31 = vld [vmem:[%s1311_s5 + $0x8] sm:$0xff] }
   0xa   :  { %v41_v29 = vld [vmem:[%s1309_s0 + $0x78] sm:$0xff]  ;;  %v510_v32 = vld [vmem:[%s1311_s5 + $0x10] sm:$0xff]  ;;  %v1003_v33 = vpack.c.bf16 %v509_v31, %v508_v30  ;;  %v760_v36 = vld [vmem:[%s1312_s2] ss:$0 sm:$0xff] }
   0xb   :  { %v511_v34 = vld [vmem:[%s1311_s5 + $0x18] sm:$0xff] }
   0xc   :  { %v1009_v35 = vpack.c.bf16 %v511_v34, %v510_v32 }
   0xd   :  { %990 = vmatpush3.bf16.xpose.msk.msra.mxu0 %vm1067_vm1, %v985_v7  ;;  %1018 = vmatpush3.bf16.xpose.msk.msra.mxu1 %vm1067_vm1, %v985_v7 }
   0xe   :  { %993 = vmatprep.subr.msk.bf16.mxu1 %vm1105_vm3, %v991_v11  ;;  %1005 = vmatprep.subr.msk.bf16.mxu0 %vm1105_vm3, %v1003_v33 }
  0x14   :  { %892 = vmatmul.mubr.msk.f32.vlgmr.msra.gmra.mrb[0].mxu0 %vm53_vm0, %v27_v15  ;;  %904 = vmatmul.mubr.msk.f32.vlgmr.msra.gmra.mrb[0].mxu1 %vm53_vm0, %v35_v16 }
  0x15   :  { %894 = vmatprep.mubr.msk.f32.mxu0 %vm53_vm0, %v28_v17  ;;  %906 = vmatprep.mubr.msk.f32.mxu1 %vm53_vm0, %v36_v18 }
  0x16   :  { %996 = vmatpush3.bf16.xpose.msk.msra.mxu1 %vm1105_vm3, %v991_v11  ;;  %1008 = vmatpush3.bf16.xpose.msk.msra.mxu0 %vm1105_vm3, %v1003_v33 }
  0x17   :  { %999 = vmatprep.subr.msk.bf16.mxu1 %vm1105_vm3, %v997_v19  ;;  %1011 = vmatprep.subr.msk.bf16.mxu0 %vm1105_vm3, %v1009_v35 }
  0x18   :  { %895 = vmatmul.mubr.msk.f32.gmra.mrb[2].mxu0 %vm53_vm0, %v29_v20  ;;  %907 = vmatmul.mubr.msk.f32.gmra.mrb[2].mxu1 %vm53_vm0, %v37_v21  ;;  %v781_v21 = vld [vmem:[%s1313_s4] ss:$0 sm:$0xff] }
  0x19   :  { %897 = vmatprep.mubr.msk.f32.mxu0 %vm53_vm0, %v30_v22  ;;  %909 = vmatprep.mubr.msk.f32.mxu1 %vm53_vm0, %v38_v23 }
  0x1c   :  { %898 = vmatmul.mubr.msk.f32.gmra.mrb[4].mxu0 %vm53_vm0, %v31_v24  ;;  %910 = vmatmul.mubr.msk.f32.gmra.mrb[4].mxu1 %vm53_vm0, %v39_v25 }
  0x1d   :  { %900 = vmatprep.mubr.msk.f32.mxu0 %vm53_vm0, %v32_v26  ;;  %912 = vmatprep.mubr.msk.f32.mxu1 %vm53_vm0, %v40_v27 }
  0x1e   :  { %1002 = vmatpush3.bf16.xpose.msk.msra.mxu1 %vm1105_vm3, %v997_v19  ;;  %1014 = vmatpush3.bf16.xpose.msk.msra.mxu0 %vm1105_vm3, %v1009_v35 }
  0x20   :  { %901 = vmatmul.mubr.msk.f32.gmra.mrb[6].mxu0 %vm53_vm0, %v33_v28  ;;  %913 = vmatmul.mubr.msk.f32.gmra.mrb[6].mxu1 %vm53_vm0, %v41_v29 }
  0xe7   :  { %v893_v37 = vpop.f32.mrb[0].mxu0  ;;  %v905_v38 = vpop.f32.mrb[0].mxu1 }
  0xe8   :  { %v186_v39 = vadd.f32 %v893_v37, %v760_v36  ;;  %v180_v40 = vpop.f32.mrb[1].mxu0  ;;  %v220_v41 = vpop.f32.mrb[1].mxu1  ;;  %v226_v8 = vadd.f32 %v905_v38, %v760_v36 }
  0xe9   :  { %v181_v42 = vadd.f32 %v760_v36, %v180_v40  ;;  %v221_v61 = vadd.f32 %v760_v36, %v220_v41 }
  0xea   :  { %v260_v46 = vmax.f32 %v186_v39, 0.0  ;;  %v268_v11 = vmax.f32 %v226_v8, 0.0 }
  0xeb   :  { %v259_v43 = vmax.f32 %v181_v42, 0.0  ;;  %v896_v44 = vpop.f32.mrb[2].mxu0  ;;  %v908_v45 = vpop.f32.mrb[2].mxu1  ;;  %v267_v5 = vmax.f32 %v221_v61, 0.0 }
  0xec   :  { %v196_v47 = vadd.f32 %v896_v44, %v760_v36  ;;  %v190_v48 = vpop.f32.mrb[3].mxu0  ;;  %v230_v49 = vpop.f32.mrb[3].mxu1  ;;  %v236_v12 = vadd.f32 %v908_v45, %v760_v36 }
  0xed   :  { %v191_v50 = vadd.f32 %v760_v36, %v190_v48  ;;  %923 = vmatprep.mubr.msk.f32.mxu1 %vm286_vm2, %v259_v43  ;;  %v231_v6 = vadd.f32 %v760_v36, %v230_v49 }
  0xee   :  { %924 = vmatmul.mubr.msk.f32.vlgmr.msra.gmra.mrb[8].mxu1 %vm286_vm2, %v260_v46  ;;  %v262_v54 = vmax.f32 %v196_v47, 0.0  ;;  %v270_v15 = vmax.f32 %v236_v12, 0.0 }
  0xef   :  { %v261_v51 = vmax.f32 %v191_v50, 0.0  ;;  %v899_v52 = vpop.f32.mrb[4].mxu0  ;;  %v911_v53 = vpop.f32.mrb[4].mxu1  ;;  %v269_v9 = vmax.f32 %v231_v6, 0.0  ;;  %v802_v6 = vld [vmem:[%s1314_s6] ss:$0 sm:$0xff] }
  0xf0   :  { %v206_v55 = vadd.f32 %v899_v52, %v760_v36  ;;  %v200_v56 = vpop.f32.mrb[5].mxu0  ;;  %v240_v57 = vpop.f32.mrb[5].mxu1  ;;  %v246_v16 = vadd.f32 %v911_v53, %v760_v36 }
  0xf1   :  { %v201_v58 = vadd.f32 %v760_v36, %v200_v56  ;;  %926 = vmatprep.mubr.msk.f32.mxu1 %vm286_vm2, %v261_v51  ;;  %v241_v10 = vadd.f32 %v760_v36, %v240_v57 }
  0xf2   :  { %927 = vmatmul.mubr.msk.f32.gmra.mrb[10].mxu1 %vm286_vm2, %v262_v54  ;;  %v264_v63 = vmax.f32 %v206_v55, 0.0  ;;  %v272_v18 = vmax.f32 %v246_v16, 0.0 }
  0xf3   :  { %v263_v59 = vmax.f32 %v201_v58, 0.0  ;;  %v902_v60 = vpop.f32.mrb[6].mxu0  ;;  %v914_v62 = vpop.f32.mrb[6].mxu1  ;;  %v271_v13 = vmax.f32 %v241_v10, 0.0 }
  0xf4   :  { %v216_v0 = vadd.f32 %v902_v60, %v760_v36  ;;  %v210_v1 = vpop.f32.mrb[7].mxu0  ;;  %v250_v2 = vpop.f32.mrb[7].mxu1  ;;  %v256_v19 = vadd.f32 %v914_v62, %v760_v36 }
  0xf5   :  { %v211_v3 = vadd.f32 %v760_v36, %v210_v1  ;;  %929 = vmatprep.mubr.msk.f32.mxu1 %vm286_vm2, %v263_v59  ;;  %v251_v14 = vadd.f32 %v760_v36, %v250_v2 }
  0xf6   :  { %930 = vmatmul.mubr.msk.f32.gmra.mrb[12].mxu1 %vm286_vm2, %v264_v63  ;;  %v266_v7 = vmax.f32 %v216_v0, 0.0  ;;  %v274_v20 = vmax.f32 %v256_v19, 0.0 }
  0xf7   :  { %v265_v4 = vmax.f32 %v211_v3, 0.0  ;;  %v273_v17 = vmax.f32 %v251_v14, 0.0 }
  0xf9   :  { %932 = vmatprep.mubr.msk.f32.mxu1 %vm286_vm2, %v265_v4 }
  0xfa   :  { %933 = vmatmul.mubr.msk.f32.gmra.mrb[14].mxu1 %vm286_vm2, %v266_v7 }
  0xfb   :  { %935 = vmatprep.mubr.msk.f32.mxu1 %vm286_vm2, %v267_v5 }
  0xfe   :  { %936 = vmatmul.mubr.msk.f32.gmra.mrb[16].mxu1 %vm286_vm2, %v268_v11 }
  0xff   :  { %938 = vmatprep.mubr.msk.f32.mxu1 %vm286_vm2, %v269_v9 }
 0x102   :  { %939 = vmatmul.mubr.msk.f32.gmra.mrb[18].mxu1 %vm286_vm2, %v270_v15 }
 0x103   :  { %941 = vmatprep.mubr.msk.f32.mxu1 %vm286_vm2, %v271_v13 }
 0x106   :  { %942 = vmatmul.mubr.msk.f32.gmra.mrb[20].mxu1 %vm286_vm2, %v272_v18 }
 0x107   :  { %944 = vmatprep.mubr.msk.f32.mxu1 %vm286_vm2, %v273_v17 }
 0x10a   :  { %945 = vmatmul.mubr.msk.f32.gmra.mrb[22].mxu1 %vm286_vm2, %v274_v20 }
 0x1c1   :  { %v925_v22 = vpop.f32.mrb[8].mxu1 }
 0x1c2   :  { %v419_v23 = vadd.f32 %v925_v22, %v781_v21  ;;  %v413_v24 = vpop.f32.mrb[9].mxu1 }
 0x1c3   :  { %v414_v25 = vadd.f32 %v781_v21, %v413_v24 }
 0x1c4   :  { %v493_v28 = vmax.f32 %v419_v23, 0.0 }
 0x1c5   :  { %v492_v26 = vmax.f32 %v414_v25, 0.0  ;;  %v928_v27 = vpop.f32.mrb[10].mxu1 }
 0x1c6   :  { %v429_v29 = vadd.f32 %v928_v27, %v781_v21  ;;  %v423_v30 = vpop.f32.mrb[11].mxu1 }
 0x1c7   :  { %v424_v31 = vadd.f32 %v781_v21, %v423_v30  ;;  %955 = vmatprep.mubr.msk.f32.mxu0 %vm286_vm2, %v492_v26 }
 0x1c8   :  { %956 = vmatmul.mubr.msk.f32.vlgmr.msra.gmra.mrb[8].mxu0 %vm286_vm2, %v493_v28  ;;  %v495_v34 = vmax.f32 %v429_v29, 0.0 }
 0x1c9   :  { %v494_v32 = vmax.f32 %v424_v31, 0.0  ;;  %v931_v33 = vpop.f32.mrb[12].mxu1 }
 0x1ca   :  { %v439_v35 = vadd.f32 %v931_v33, %v781_v21  ;;  %v433_v36 = vpop.f32.mrb[13].mxu1 }
 0x1cb   :  { %v434_v37 = vadd.f32 %v781_v21, %v433_v36  ;;  %958 = vmatprep.mubr.msk.f32.mxu0 %vm286_vm2, %v494_v32 }
 0x1cc   :  { %959 = vmatmul.mubr.msk.f32.gmra.mrb[10].mxu0 %vm286_vm2, %v495_v34  ;;  %v497_v40 = vmax.f32 %v439_v35, 0.0 }
 0x1cd   :  { %v496_v38 = vmax.f32 %v434_v37, 0.0  ;;  %v934_v39 = vpop.f32.mrb[14].mxu1 }
 0x1ce   :  { %v449_v41 = vadd.f32 %v934_v39, %v781_v21  ;;  %v443_v42 = vpop.f32.mrb[15].mxu1 }
 0x1cf   :  { %v444_v43 = vadd.f32 %v781_v21, %v443_v42  ;;  %961 = vmatprep.mubr.msk.f32.mxu0 %vm286_vm2, %v496_v38 }
 0x1d0   :  { %962 = vmatmul.mubr.msk.f32.gmra.mrb[12].mxu0 %vm286_vm2, %v497_v40  ;;  %v499_v46 = vmax.f32 %v449_v41, 0.0 }
 0x1d1   :  { %v498_v44 = vmax.f32 %v444_v43, 0.0  ;;  %v937_v45 = vpop.f32.mrb[16].mxu1 }
 0x1d2   :  { %v459_v47 = vadd.f32 %v937_v45, %v781_v21  ;;  %v453_v48 = vpop.f32.mrb[17].mxu1 }
 0x1d3   :  { %v454_v49 = vadd.f32 %v781_v21, %v453_v48  ;;  %964 = vmatprep.mubr.msk.f32.mxu0 %vm286_vm2, %v498_v44 }
 0x1d4   :  { %965 = vmatmul.mubr.msk.f32.gmra.mrb[14].mxu0 %vm286_vm2, %v499_v46  ;;  %v501_v52 = vmax.f32 %v459_v47, 0.0 }
 0x1d5   :  { %v500_v50 = vmax.f32 %v454_v49, 0.0  ;;  %v940_v51 = vpop.f32.mrb[18].mxu1 }
 0x1d6   :  { %v469_v53 = vadd.f32 %v940_v51, %v781_v21  ;;  %v463_v54 = vpop.f32.mrb[19].mxu1 }
 0x1d7   :  { %v464_v55 = vadd.f32 %v781_v21, %v463_v54  ;;  %967 = vmatprep.mubr.msk.f32.mxu0 %vm286_vm2, %v500_v50 }
 0x1d8   :  { %968 = vmatmul.mubr.msk.f32.gmra.mrb[16].mxu0 %vm286_vm2, %v501_v52  ;;  %v503_v58 = vmax.f32 %v469_v53, 0.0 }
 0x1d9   :  { %v502_v56 = vmax.f32 %v464_v55, 0.0  ;;  %v943_v57 = vpop.f32.mrb[20].mxu1 }
 0x1da   :  { %v479_v59 = vadd.f32 %v943_v57, %v781_v21  ;;  %v473_v60 = vpop.f32.mrb[21].mxu1 }
 0x1db   :  { %v474_v61 = vadd.f32 %v781_v21, %v473_v60  ;;  %970 = vmatprep.mubr.msk.f32.mxu0 %vm286_vm2, %v502_v56 }
 0x1dc   :  { %971 = vmatmul.mubr.msk.f32.gmra.mrb[18].mxu0 %vm286_vm2, %v503_v58  ;;  %v505_v0 = vmax.f32 %v479_v59, 0.0 }
 0x1dd   :  { %v504_v62 = vmax.f32 %v474_v61, 0.0  ;;  %v946_v63 = vpop.f32.mrb[22].mxu1 }
 0x1de   :  { %v489_v1 = vadd.f32 %v946_v63, %v781_v21  ;;  %v483_v2 = vpop.f32.mrb[23].mxu1 }
 0x1df   :  { %v484_v3 = vadd.f32 %v781_v21, %v483_v2  ;;  %973 = vmatprep.mubr.msk.f32.mxu0 %vm286_vm2, %v504_v62 }
 0x1e0   :  { %974 = vmatmul.mubr.msk.f32.gmra.mrb[20].mxu0 %vm286_vm2, %v505_v0  ;;  %v507_v5 = vmax.f32 %v489_v1, 0.0 }
 0x1e1   :  { %v506_v4 = vmax.f32 %v484_v3, 0.0 }
 0x1e3   :  { %976 = vmatprep.mubr.msk.f32.mxu0 %vm286_vm2, %v506_v4 }
 0x1e4   :  { %977 = vmatmul.mubr.msk.f32.gmra.mrb[22].mxu0 %vm286_vm2, %v507_v5 }
 0x29b   :  { %v957_v7 = vpop.f32.mrb[8].mxu0 }
 0x29c   :  { %v651_v8 = vadd.f32 %v957_v7, %v802_v6  ;;  %v645_v9 = vpop.f32.mrb[9].mxu0 }
 0x29d   :  { %v646_v10 = vadd.f32 %v802_v6, %v645_v9 }
 0x29e   :  { %v725_v11 = vmax.f32 %v651_v8, 0.0 }
 0x29f   :  { %v724_v12 = vmax.f32 %v646_v10, 0.0  ;;  %v960_v13 = vpop.f32.mrb[10].mxu0 }
 0x2a0   :  { %741 = vst.msk [vmem:[%s1315_s7 + $0x8] sm:$0xff] %vm286_vm2, %v725_v11  ;;  %v661_v14 = vadd.f32 %v960_v13, %v802_v6  ;;  %v655_v15 = vpop.f32.mrb[11].mxu0 }
 0x2a1   :  { %740 = vst.msk [vmem:[%s1315_s7] sm:$0xff] %vm286_vm2, %v724_v12  ;;  %v656_v16 = vadd.f32 %v802_v6, %v655_v15 }
 0x2a2   :  { %v727_v17 = vmax.f32 %v661_v14, 0.0 }
 0x2a3   :  { %v726_v18 = vmax.f32 %v656_v16, 0.0  ;;  %v963_v19 = vpop.f32.mrb[12].mxu0 }
 0x2a4   :  { %743 = vst.msk [vmem:[%s1315_s7 + $0x18] sm:$0xff] %vm286_vm2, %v727_v17  ;;  %v671_v20 = vadd.f32 %v963_v19, %v802_v6  ;;  %v665_v21 = vpop.f32.mrb[13].mxu0 }
 0x2a5   :  { %742 = vst.msk [vmem:[%s1315_s7 + $0x10] sm:$0xff] %vm286_vm2, %v726_v18  ;;  %v666_v22 = vadd.f32 %v802_v6, %v665_v21 }
 0x2a6   :  { %v729_v23 = vmax.f32 %v671_v20, 0.0 }
 0x2a7   :  { %v728_v24 = vmax.f32 %v666_v22, 0.0  ;;  %v966_v25 = vpop.f32.mrb[14].mxu0 }
 0x2a8   :  { %745 = vst.msk [vmem:[%s1315_s7 + $0x28] sm:$0xff] %vm286_vm2, %v729_v23  ;;  %v681_v26 = vadd.f32 %v966_v25, %v802_v6  ;;  %v675_v27 = vpop.f32.mrb[15].mxu0 }
 0x2a9   :  { %744 = vst.msk [vmem:[%s1315_s7 + $0x20] sm:$0xff] %vm286_vm2, %v728_v24  ;;  %v676_v28 = vadd.f32 %v802_v6, %v675_v27 }
 0x2aa   :  { %v731_v29 = vmax.f32 %v681_v26, 0.0 }
 0x2ab   :  { %v730_v30 = vmax.f32 %v676_v28, 0.0  ;;  %v969_v31 = vpop.f32.mrb[16].mxu0 }
 0x2ac   :  { %747 = vst.msk [vmem:[%s1315_s7 + $0x38] sm:$0xff] %vm286_vm2, %v731_v29  ;;  %v691_v32 = vadd.f32 %v969_v31, %v802_v6  ;;  %v685_v33 = vpop.f32.mrb[17].mxu0 }
 0x2ad   :  { %746 = vst.msk [vmem:[%s1315_s7 + $0x30] sm:$0xff] %vm286_vm2, %v730_v30  ;;  %v686_v34 = vadd.f32 %v802_v6, %v685_v33 }
 0x2ae   :  { %v733_v35 = vmax.f32 %v691_v32, 0.0 }
 0x2af   :  { %v732_v36 = vmax.f32 %v686_v34, 0.0  ;;  %v972_v37 = vpop.f32.mrb[18].mxu0 }
 0x2b0   :  { %749 = vst.msk [vmem:[%s1315_s7 + $0x48] sm:$0xff] %vm286_vm2, %v733_v35  ;;  %v701_v38 = vadd.f32 %v972_v37, %v802_v6  ;;  %v695_v39 = vpop.f32.mrb[19].mxu0 }
 0x2b1   :  { %748 = vst.msk [vmem:[%s1315_s7 + $0x40] sm:$0xff] %vm286_vm2, %v732_v36  ;;  %v696_v40 = vadd.f32 %v802_v6, %v695_v39 }
 0x2b2   :  { %v735_v41 = vmax.f32 %v701_v38, 0.0 }
 0x2b3   :  { %v734_v42 = vmax.f32 %v696_v40, 0.0  ;;  %v975_v43 = vpop.f32.mrb[20].mxu0 }
 0x2b4   :  { %751 = vst.msk [vmem:[%s1315_s7 + $0x58] sm:$0xff] %vm286_vm2, %v735_v41  ;;  %v711_v44 = vadd.f32 %v975_v43, %v802_v6  ;;  %v705_v45 = vpop.f32.mrb[21].mxu0 }
 0x2b5   :  { %750 = vst.msk [vmem:[%s1315_s7 + $0x50] sm:$0xff] %vm286_vm2, %v734_v42  ;;  %v706_v46 = vadd.f32 %v802_v6, %v705_v45 }
 0x2b6   :  { %v737_v47 = vmax.f32 %v711_v44, 0.0 }
 0x2b7   :  { %v736_v48 = vmax.f32 %v706_v46, 0.0  ;;  %v978_v49 = vpop.f32.mrb[22].mxu0 }
 0x2b8   :  { %753 = vst.msk [vmem:[%s1315_s7 + $0x68] sm:$0xff] %vm286_vm2, %v737_v47  ;;  %v721_v50 = vadd.f32 %v978_v49, %v802_v6  ;;  %v715_v51 = vpop.f32.mrb[23].mxu0 }
 0x2b9   :  { %752 = vst.msk [vmem:[%s1315_s7 + $0x60] sm:$0xff] %vm286_vm2, %v736_v48  ;;  %v716_v52 = vadd.f32 %v802_v6, %v715_v51 }
 0x2ba   :  { %v739_v53 = vmax.f32 %v721_v50, 0.0 }
 0x2bb   :  { %v738_v54 = vmax.f32 %v716_v52, 0.0 }
 0x2bc   :  { %755 = vst.msk [vmem:[%s1315_s7 + $0x78] sm:$0xff] %vm286_vm2, %v739_v53 }
 0x2bd   :  { %754 = vst.msk [vmem:[%s1315_s7 + $0x70] sm:$0xff] %vm286_vm2, %v738_v54 }

</bundles_post_ra>
